<compile_context>
chip_gen: v5e
topology: v5e:2x2
jax: 0.10.0
libtpu: 0.0.40
codegen_flags: <defaults>
</compile_context>

<pallas_src>
import functools

import jax
import jax.numpy as jnp
from jax.experimental import pallas as pl
from jax.experimental.pallas import tpu as pltpu

_LANE = 128
_MAX_BLOCK_B = 8192  # keeps state tile + h1/h2 scratch well under v7x's VMEM


def _round_up(x, m):
    return (x + m - 1) // m * m


def _layout(input_dims, fc1_dims, fc2_dims, output_dims):
    """Offsets / padded widths for the packed bf16-weight and f32-param blobs.

    bf16 weight blob (width = max(fc1_p, fc2_p)), 16-row (bf16 sublane tile)
    aligned sections:         [ w1 | w2 ]
    f32 param blob (same width), 8-row aligned sections:
                              [ b1 | b2 | w3^T | b3(column) ]
    All layer widths are zero-padded to 128 lanes.
    """
    fc1_p = _round_up(fc1_dims, _LANE)
    fc2_p = _round_up(fc2_dims, _LANE)
    width = max(fc1_p, fc2_p, _round_up(output_dims, _LANE))

    r_w1 = 0
    r_w2 = _round_up(input_dims, 16)
    w_rows = r_w2 + fc1_p

    r_b1 = 0
    r_b2 = 8
    r_w3 = 16
    r_b3 = r_w3 + _round_up(output_dims, 8)
    p_rows = r_b3 + _round_up(output_dims, 8)

    return fc1_p, fc2_p, width, w_rows, p_rows, (r_w1, r_w2, r_b1, r_b2,
                                                 r_w3, r_b3)


def pack_value_net_params(w1, b1, w2, b2, w3, b3):
    """Pack layer params into one bf16 weight blob + one f32 bias/head blob."""
    input_dims, fc1_dims = w1.shape
    fc2_dims = w2.shape[1]
    output_dims = w3.shape[1]
    fc1_p, fc2_p, width, w_rows, p_rows, offs = _layout(
        input_dims, fc1_dims, fc2_dims, output_dims)
    r_w1, r_w2, r_b1, r_b2, r_w3, r_b3 = offs

    wblob = jnp.zeros((w_rows, width), jnp.bfloat16)
    wblob = wblob.at[r_w1:r_w1 + input_dims, :fc1_dims].set(
        w1.astype(jnp.bfloat16))
    wblob = wblob.at[r_w2:r_w2 + fc1_dims, :fc2_dims].set(
        w2.astype(jnp.bfloat16))

    pblob = jnp.zeros((p_rows, width), jnp.float32)
    pblob = pblob.at[r_b1, :fc1_dims].set(b1.reshape(fc1_dims))
    pblob = pblob.at[r_b2, :fc2_dims].set(b2.reshape(fc2_dims))
    pblob = pblob.at[r_w3:r_w3 + output_dims, :fc2_dims].set(w3.T)
    pblob = pblob.at[r_b3:r_b3 + output_dims, 0].set(b3.reshape(output_dims))
    return wblob, pblob


def value_net_kernel(x_ref, w_ref, p_ref, o_ref, *, input_dims, fc1_dims,
                     fc2_dims, output_dims):
    fc1_p, fc2_p, _, _, _, offs = _layout(input_dims, fc1_dims, fc2_dims,
                                          output_dims)
    r_w1, r_w2, r_b1, r_b2, r_w3, r_b3 = offs
    bf16 = jnp.bfloat16

    # layer 1: Linear(input_dims -> fc1) + ReLU  (bf16 MXU operands, f32 acc)
    x = x_ref[...]                                          # (block_b, in) bf16
    w1 = w_ref[r_w1:r_w1 + input_dims, 0:fc1_p]             # (in, fc1_p) bf16
    b1 = p_ref[r_b1:r_b1 + 1, 0:fc1_p]                      # (1, fc1_p)  f32
    h1 = jnp.dot(x, w1, preferred_element_type=jnp.float32)
    h1 = jnp.maximum(h1 + b1, 0.0)                          # (block_b, fc1_p)

    # layer 2: Linear(fc1 -> fc2) + ReLU
    w2 = w_ref[r_w2:r_w2 + fc1_p, 0:fc2_p]                  # (fc1_p, fc2_p)
    b2 = p_ref[r_b2:r_b2 + 1, 0:fc2_p]
    h2 = jnp.dot(h1.astype(bf16), w2, preferred_element_type=jnp.float32)
    h2 = jnp.maximum(h2 + b2, 0.0)                          # (block_b, fc2_p)

    # output head: Linear(fc2 -> output_dims), no activation. output_dims is
    # tiny (1 for a value head) -> VPU broadcast-mul + lane reduce instead of
    # an N=1 MXU pass; written lane-dense as (output_dims, block_b).
    rows = []
    for o in range(output_dims):                            # static, tiny
        w3_row = p_ref[r_w3 + o:r_w3 + o + 1, 0:fc2_p]      # (1, fc2_p) f32
        rows.append(jnp.sum(h2 * w3_row, axis=-1))          # (block_b,)
    b3 = p_ref[r_b3:r_b3 + output_dims, 0:1]                # (out, 1) f32
    o_ref[...] = (jnp.stack(rows, axis=0) + b3).astype(o_ref.dtype)


@functools.partial(
    jax.jit,
    static_argnames=("input_dims", "fc1_dims", "fc2_dims", "output_dims"))
def value_network_forward(state, w_blob, p_blob, *, input_dims, fc1_dims,
                          fc2_dims, output_dims):
    B = state.shape[0]

    # Batch tiling:
    #  * B <= 128: single 128-row block (full-lane output store).
    #  * B  > 128: at least 2 grid steps (shards across both v7x TensorCores),
    #    tiles capped at 8192 rows so per-step work dwarfs the ~0.35 us fixed
    #    grid-step overhead while staying far inside VMEM on every generation.
    if B <= _LANE:
        block_b = _LANE
    else:
        half = _round_up(-(-_round_up(B, _LANE) // 2), _LANE)
        block_b = min(_MAX_BLOCK_B, half)
    Bp = _round_up(B, block_b)

    # state dominates HBM traffic -> feed it bf16 (the MXU operand dtype),
    # padded to a whole number of batch blocks. Padded rows are sliced off.
    x = state.astype(jnp.bfloat16)
    if Bp != B:
        x = jnp.pad(x, ((0, Bp - B), (0, 0)))

    kernel = functools.partial(
        value_net_kernel, input_dims=input_dims, fc1_dims=fc1_dims,
        fc2_dims=fc2_dims, output_dims=output_dims)

    out_t = pl.pallas_call(
        kernel,
        out_shape=jax.ShapeDtypeStruct((output_dims, Bp), jnp.float32),
        grid=(Bp // block_b,),
        in_specs=[
            # state: tiled over the batch axis.
            pl.BlockSpec((block_b, input_dims), lambda i: (i, 0)),
            # packed params: constant block index -> fetched once, stays
            # VMEM-resident across all grid steps.
            pl.BlockSpec(w_blob.shape, lambda i: (0, 0)),
            pl.BlockSpec(p_blob.shape, lambda i: (0, 0)),
        ],
        # transposed, lane-dense output: (output_dims, batch)
        out_specs=pl.BlockSpec((output_dims, block_b), lambda i: (0, i)),
        compiler_params=pltpu.CompilerParams(
            dimension_semantics=("parallel",)),
    )(x, w_blob, p_blob)

    return out_t.T[:B]                                      # (B, output_dims)


def init_linear_params(key, in_dims, out_dims):
    """PyTorch nn.Linear default init: U(-1/sqrt(in), 1/sqrt(in))."""
    kw, kb = jax.random.split(key)
    bound = 1.0 / jnp.sqrt(jnp.float32(in_dims))
    # stored as [in, out] (transposed vs. PyTorch's [out, in]) so x @ W works.
    w = jax.random.uniform(kw, (in_dims, out_dims), jnp.float32, -bound, bound)
    b = jax.random.uniform(kb, (1, out_dims), jnp.float32, -bound, bound)
    return w, b


if __name__ == "__main__":
    # ValueNetwork(input_dims, output_dims, fc1_dims, fc2_dims, beta)
    batch = 8
    input_dims = 32
    fc1_dims = 64
    fc2_dims = 64
    output_dims = 1

    key = jax.random.PRNGKey(0)
    k_x, k1, k2, k3 = jax.random.split(key, 4)

    state = jax.random.normal(k_x, (batch, input_dims), jnp.float32)
    w1, b1 = init_linear_params(k1, input_dims, fc1_dims)
    w2, b2 = init_linear_params(k2, fc1_dims, fc2_dims)
    w3, b3 = init_linear_params(k3, fc2_dims, output_dims)

    # Pack once (outside the per-step jit): weights pre-cast to bf16, widths
    # zero-padded to 128 lanes.
    w_blob, p_blob = pack_value_net_params(w1, b1, w2, b2, w3, b3)

    value = value_network_forward(
        state, w_blob, p_blob, input_dims=input_dims, fc1_dims=fc1_dims,
        fc2_dims=fc2_dims, output_dims=output_dims)
    value = jax.block_until_ready(value)
    assert value.shape == (batch, output_dims)

    # Reference matching the kernel's math (bf16 MXU operands, f32 accumulate).
    bf = jnp.bfloat16
    h1 = jnp.maximum(
        jnp.dot(state.astype(bf), w1.astype(bf),
                preferred_element_type=jnp.float32) + b1, 0.0)
    h2 = jnp.maximum(
        jnp.dot(h1.astype(bf), w2.astype(bf),
                preferred_element_type=jnp.float32) + b2, 0.0)
    ref_bf16 = h2 @ w3 + b3
    assert jnp.allclose(value, ref_bf16, atol=1e-3, rtol=1e-3)

    # Loose sanity check against the pure-f32 PyTorch-semantics forward.
    h1f = jnp.maximum(state @ w1 + b1, 0.0)
    h2f = jnp.maximum(h1f @ w2 + b2, 0.0)
    ref_f32 = h2f @ w3 + b3
    assert jnp.allclose(value, ref_f32, atol=5e-2, rtol=5e-2)

    print("KERNEL_OK")
</pallas_src>

<mosaic_0001>
module attributes {stable_mosaic.version = 11 : i64} {
  func.func @value_net_kernel(%arg0: i32, %arg1: memref<128x32xbf16, #tpu.memory_space<vmem>>, %arg2: memref<160x128xbf16, #tpu.memory_space<vmem>>, %arg3: memref<32x128xf32, #tpu.memory_space<vmem>>, %arg4: memref<1x128xf32, #tpu.memory_space<vmem>>) attributes {dimension_semantics = [#tpu.dimension_semantics<parallel>], iteration_bounds = array<i64: 1>, scalar_prefetch = 0 : i64, scratch_operands = 0 : i64, tpu.core_type = #tpu.core_type<tc>, window_params = [{transform_indices = @transform_0, window_bounds = array<i64: 128, 32>}, {pipeline_mode = #tpu.pipeline_mode<synchronous>, transform_indices = @transform_1, window_bounds = array<i64: 160, 128>}, {pipeline_mode = #tpu.pipeline_mode<synchronous>, transform_indices = @transform_2, window_bounds = array<i64: 32, 128>}, {transform_indices = @transform_3, window_bounds = array<i64: 1, 128>}]} {
    %c0 = arith.constant 0 : index
    %c0_0 = arith.constant 0 : index
    %0 = vector.load %arg1[%c0, %c0_0] : memref<128x32xbf16, #tpu.memory_space<vmem>>, vector<128x32xbf16>
    %c0_1 = arith.constant 0 : index
    %c0_2 = arith.constant 0 : index
    %1 = vector.load %arg2[%c0_1, %c0_2] : memref<160x128xbf16, #tpu.memory_space<vmem>>, vector<32x128xbf16>
    %c0_3 = arith.constant 0 : index
    %c0_4 = arith.constant 0 : index
    %2 = vector.load %arg3[%c0_3, %c0_4] : memref<32x128xf32, #tpu.memory_space<vmem>>, vector<1x128xf32>
    %cst = arith.constant dense<0.000000e+00> : vector<128x128xf32>
    %3 = tpu.matmul %0, %1, %cst {dimension_numbers = #tpu.dot_dimension_numbers<[1], [0], [0], [1], [0, 0, 1, 1], [], []>} : vector<128x32xbf16>, vector<32x128xbf16>, vector<128x128xf32> -> vector<128x128xf32>
    %4 = vector.broadcast %2 : vector<1x128xf32> to vector<128x128xf32>
    %5 = arith.addf %3, %4 : vector<128x128xf32>
    %cst_5 = arith.constant 0.000000e+00 : f32
    %6 = vector.broadcast %cst_5 : f32 to vector<128x128xf32>
    %7 = arith.maximumf %5, %6 : vector<128x128xf32>
    %c32 = arith.constant 32 : index
    %c0_6 = arith.constant 0 : index
    %8 = vector.load %arg2[%c32, %c0_6] : memref<160x128xbf16, #tpu.memory_space<vmem>>, vector<128x128xbf16>
    %c8 = arith.constant 8 : index
    %c0_7 = arith.constant 0 : index
    %9 = vector.load %arg3[%c8, %c0_7] : memref<32x128xf32, #tpu.memory_space<vmem>>, vector<1x128xf32>
    %10 = arith.truncf %7 : vector<128x128xf32> to vector<128x128xbf16>
    %cst_8 = arith.constant dense<0.000000e+00> : vector<128x128xf32>
    %11 = tpu.matmul %10, %8, %cst_8 {dimension_numbers = #tpu.dot_dimension_numbers<[1], [0], [0], [1], [0, 0, 1, 1], [], []>} : vector<128x128xbf16>, vector<128x128xbf16>, vector<128x128xf32> -> vector<128x128xf32>
    %12 = vector.broadcast %9 : vector<1x128xf32> to vector<128x128xf32>
    %13 = arith.addf %11, %12 : vector<128x128xf32>
    %cst_9 = arith.constant 0.000000e+00 : f32
    %14 = vector.broadcast %cst_9 : f32 to vector<128x128xf32>
    %15 = arith.maximumf %13, %14 : vector<128x128xf32>
    %c16 = arith.constant 16 : index
    %c0_10 = arith.constant 0 : index
    %16 = vector.load %arg3[%c16, %c0_10] : memref<32x128xf32, #tpu.memory_space<vmem>>, vector<1x128xf32>
    %17 = vector.broadcast %16 : vector<1x128xf32> to vector<128x128xf32>
    %18 = arith.mulf %15, %17 : vector<128x128xf32>
    %cst_11 = arith.constant dense<0.000000e+00> : vector<128xf32>
    %19 = vector.multi_reduction <add>, %18, %cst_11 [1] : vector<128x128xf32> to vector<128xf32>
    %c24 = arith.constant 24 : index
    %c0_12 = arith.constant 0 : index
    %20 = vector.load %arg3[%c24, %c0_12] : memref<32x128xf32, #tpu.memory_space<vmem>>, vector<1x1xf32>
    %21 = vector.shape_cast %19 : vector<128xf32> to vector<1x128xf32>
    %22 = vector.broadcast %20 : vector<1x1xf32> to vector<1x128xf32>
    %23 = arith.addf %21, %22 : vector<1x128xf32>
    %c0_13 = arith.constant 0 : index
    %c0_14 = arith.constant 0 : index
    %24 = vector.load %arg4[%c0_13, %c0_14] : memref<1x128xf32, #tpu.memory_space<vmem>>, vector<1x128xf32>
    tpu.vector_store %arg4[%c0_13, %c0_14], %23 {strides = array<i32>} : memref<1x128xf32, #tpu.memory_space<vmem>>, vector<1x128xf32>,
    return
  }
  func.func @transform_0(%arg0: i32) -> (i32, i32) {
    %c0_i32 = arith.constant 0 : i32
    %c0_i32_0 = arith.constant 0 : i32
    return %arg0, %c0_i32 : i32, i32
  }
  func.func @transform_1(%arg0: i32) -> (i32, i32) {
    %c0_i32 = arith.constant 0 : i32
    %c0_i32_0 = arith.constant 0 : i32
    %c0_i32_1 = arith.constant 0 : i32
    return %c0_i32, %c0_i32_0 : i32, i32
  }
  func.func @transform_2(%arg0: i32) -> (i32, i32) {
    %c0_i32 = arith.constant 0 : i32
    %c0_i32_0 = arith.constant 0 : i32
    %c0_i32_1 = arith.constant 0 : i32
    return %c0_i32, %c0_i32_0 : i32, i32
  }
  func.func @transform_3(%arg0: i32) -> (i32, i32) {
    %c0_i32 = arith.constant 0 : i32
    %c0_i32_0 = arith.constant 0 : i32
    return %c0_i32, %arg0 : i32, i32
  }
}

</mosaic_0001>

<bundles_post_ra>
// kernel: value_network_forward.1
= control target key start
LH: loop header
LB: loop body
LE: loop exit
PB: predicated region body
PF: predicated region fallthrough
CT: control target
= control target key end

     0   :  { %8 = vsyncpa [#allocation3], 0  ;;  %s685_s15 = smov [#allocation2]   ;;  %s686_s17 = smov 128   ;;  %s831_s0 = inlined_call_operand.vmem [shape: bf16[128,32], index: 0, kind: input, shape index: {}]   ;;  %s832_s1 = inlined_call_operand.vmem [shape: bf16[160,128], index: 1, kind: input, shape index: {}]   ;;  %s833_s2 = inlined_call_operand.hbm [shape: f32[32,128], index: 2, kind: input, shape index: {}]   ;;  %s834_s3 = inlined_call_operand.vmem [shape: f32[1,128], index: 3, kind: output, shape index: {}]  }
   0x1   :  { %s17_s14 = sshll.u32 %s833_s2, 4  ;;  %s19_s16 = sshll.u32 %s685_s15, 4  ;;  %s18_s14 = int_to_ptr.hbm [resolvable:$true] %s17_s14  ;;  %s20_s16 = int_to_ptr.vmem [resolvable:$true] %s19_s16 }
   0x2   :  { %s687_s18 = smov 8  }
   0x3   :  { %25 = dma.hbm_to_vmem [thread:$0]  %s18_s14, 512, %s20_s16, [#allocation3], %s686_s17, %s686_s17, %s687_s18  }
   0x4   :  { %683 = dma.done.wait [#allocation3], 512  }
   0x5   :  { %684 = vsyncadd [#allocation3], 4294966784  ;;  %v630_v0 = vld [vmem:[%s832_s1 + $0x8] sm:$0xff]  ;;  %v629_v1 = vld [vmem:[%s832_s1] sm:$0xff]  ;;  %vm105_vm0 = vcmask 261120   ;;  %v688_v57 = vmov 0  }
   0x6   :  { %136 = vmatpush.bf16.msra.mxu0 %v630_v0  ;;  %639 = vmatpush.bf16.msra.mxu3 %v630_v0  ;;  %v621_v2 = vld [vmem:[%s831_s0] sm:$0xff]  ;;  %v622_v3 = vld [vmem:[%s831_s0 + $0x8] sm:$0xff]  ;;  %v623_v4 = vld [vmem:[%s831_s0 + $0x10] sm:$0xff]  ;;  %vm476_vm1 = vcmask 130112   ;;  %vm480_vm2 = vcmask 195712   ;;  %vm484_vm3 = vcmask 261312  }
   0x7   :  { %v626_v5 = vld [vmem:[%s831_s0 + $0x28] sm:$0xff]  ;;  %v637_v7 = vld [vmem:[%s832_s1 + $0x40] sm:$0xff]  ;;  %v636_v8 = vld [vmem:[%s832_s1 + $0x38] sm:$0xff]  ;;  %653 = vset.pattern.permute.xlu1 %v688_v57  ;;  %654 = vset.pattern.permute.xlu2 %v688_v57  ;;  %vm488_vm4 = vcmask 326912   ;;  %vm492_vm5 = vcmask 392512   ;;  %vm496_vm6 = vcmask 458112  }
   0x8   :  { %v638_v6 = vld [vmem:[%s832_s1 + $0x48] sm:$0xff]  ;;  %v624_v9 = vld [vmem:[%s831_s0 + $0x18] sm:$0xff]  ;;  %v635_v10 = vld [vmem:[%s832_s1 + $0x30] sm:$0xff]  ;;  %655 = vset.pattern.permute.xlu0 %v688_v57  ;;  %vm500_vm7 = vcmask 523712   ;;  %vm504_vm8 = vcmask 589312   ;;  %vm508_vm9 = vcmask 654912  }
   0x9   :  { %269 = vmatpush.bf16.msra.mxu1 %v638_v6  ;;  %641 = vmatpush.bf16.msra.mxu2 %v638_v6  ;;  %v627_v11 = vld [vmem:[%s831_s0 + $0x30] sm:$0xff]  ;;  %v625_v12 = vld [vmem:[%s831_s0 + $0x20] sm:$0xff]  ;;  %v628_v13 = vld [vmem:[%s831_s0 + $0x38] sm:$0xff]  ;;  %vm512_vm10 = vcmask 720512   ;;  %vm516_vm11 = vcmask 786112   ;;  %vm520_vm12 = vcmask 851712  }
   0xa   :  { %137 = vmatpush.bf16.msra.mxu0 %v629_v1  ;;  %640 = vmatpush.bf16.msra.mxu3 %v629_v1  ;;  %v634_v14 = vld [vmem:[%s832_s1 + $0x28] sm:$0xff]  ;;  %v633_v15 = vld [vmem:[%s832_s1 + $0x20] sm:$0xff]  ;;  %v632_v16 = vld [vmem:[%s832_s1 + $0x18] sm:$0xff]  ;;  %vm524_vm13 = vcmask 917312   ;;  %vm528_vm14 = vcmask 982912   ;;  %vm532_vm15 = vcmask 1048512  }
   0xb   :  { %v631_v17 = vld [vmem:[%s832_s1 + $0x10] sm:$0xff]  ;;  %v774_v19 = vld [vmem:[#allocation2] ss:$0 sm:$0xff]  ;;  %v384_v56 = vld [vmem:[#allocation2 + $0x18] sm:$0x1] }
   0xc   :  { %387 = vperm.xlu1 %653, %v384_v56  }
   0xd   :  { %581 = vmatmul.msk.bf16.vlgmr.msra.gmra.mxu0 %vm105_vm0, %v621_v2  ;;  %586 = vmatmul.msk.bf16.vlgmr.msra.gmra.mxu3 %vm105_vm0, %v626_v5 }
   0xe   :  { %270 = vmatpush.bf16.msra.mxu1 %v637_v7  ;;  %642 = vmatpush.bf16.msra.mxu2 %v637_v7 }
  0x12   :  { %271 = vmatpush.bf16.msra.mxu1 %v636_v8  ;;  %643 = vmatpush.bf16.msra.mxu2 %v636_v8 }
  0x16   :  { %272 = vmatpush.bf16.msra.mxu1 %v635_v10  ;;  %644 = vmatpush.bf16.msra.mxu2 %v635_v10 }
  0x1a   :  { %273 = vmatpush.bf16.msra.mxu1 %v634_v14  ;;  %645 = vmatpush.bf16.msra.mxu2 %v634_v14 }
  0x1d   :  { %582 = vmatmul.msk.bf16.gmra.mxu0 %vm105_vm0, %v622_v3  ;;  %587 = vmatmul.msk.bf16.gmra.mxu3 %vm105_vm0, %v627_v11 }
  0x1e   :  { %274 = vmatpush.bf16.msra.mxu1 %v633_v15  ;;  %646 = vmatpush.bf16.msra.mxu2 %v633_v15 }
  0x22   :  { %275 = vmatpush.bf16.msra.mxu1 %v632_v16  ;;  %647 = vmatpush.bf16.msra.mxu2 %v632_v16  ;;  %v795_v16 = vld [vmem:[#allocation2 + $0x10] ss:$0 sm:$0xff] }
  0x26   :  { %276 = vmatpush.bf16.msra.mxu1 %v631_v17  ;;  %648 = vmatpush.bf16.msra.mxu2 %v631_v17 }
  0x2d   :  { %583 = vmatmul.msk.bf16.gmra.mxu0 %vm105_vm0, %v623_v4  ;;  %588 = vmatmul.msk.bf16.gmra.mxu3 %vm105_vm0, %v628_v13  ;;  %v792_v13 = vld [vmem:[#allocation2 + $0x8] ss:$0 sm:$0xff] }
  0x3d   :  { %584 = vmatmul.msk.bf16.gmra.mxu0 %vm105_vm0, %v624_v9 }
  0x4d   :  { %585 = vmatmul.msk.bf16.gmra.mxu0 %vm105_vm0, %v625_v12 }
  0x8a   :  { %v139_v18 = vpop.f32.mrf.mxu0 }
  0x8b   :  { %v140_v20 = vadd.f32 %v774_v19, %v139_v18 }
  0x8d   :  { %v179_v23 = vmax.f32 %v140_v20, 0.0 }
  0x90   :  { %v164_v48 = vpop.f32.mrf.mxu3 }
  0x91   :  { %v165_v59 = vadd.f32 %v774_v19, %v164_v48 }
  0x92   :  { %v141_v21 = vpop.f32.mrf.mxu0 }
  0x93   :  { %v142_v22 = vadd.f32 %v774_v19, %v141_v21  ;;  %v189_v61 = vmax.f32 %v165_v59, 0.0 }
  0x95   :  { %v180_v24 = vmax.f32 %v142_v22, 0.0 }
  0x97   :  { %v212_v25 = vpack.c.bf16 %v180_v24, %v179_v23 }
  0x98   :  { %v166_v52 = vpop.f32.mrf.mxu3 }
  0x99   :  { %277 = vmatmul.bf16.vlgmr.msra.gmra.mxu1 %v212_v25  ;;  %v167_v60 = vadd.f32 %v774_v19, %v166_v52 }
  0x9a   :  { %v144_v26 = vpop.f32.mrf.mxu0 }
  0x9b   :  { %v145_v27 = vadd.f32 %v774_v19, %v144_v26  ;;  %v190_v62 = vmax.f32 %v167_v60, 0.0 }
  0x9d   :  { %v181_v30 = vmax.f32 %v145_v27, 0.0  ;;  %v217_v63 = vpack.c.bf16 %v190_v62, %v189_v61 }
  0xa0   :  { %v169_v58 = vpop.f32.mrf.mxu3 }
  0xa1   :  { %v170_v1 = vadd.f32 %v774_v19, %v169_v58 }
  0xa2   :  { %v146_v28 = vpop.f32.mrf.mxu0 }
  0xa3   :  { %v147_v29 = vadd.f32 %v774_v19, %v146_v28  ;;  %v191_v4 = vmax.f32 %v170_v1, 0.0 }
  0xa5   :  { %v182_v31 = vmax.f32 %v147_v29, 0.0 }
  0xa7   :  { %v213_v32 = vpack.c.bf16 %v182_v31, %v181_v30 }
  0xa8   :  { %v171_v0 = vpop.f32.mrf.mxu3 }
  0xa9   :  { %282 = vmatmul.bf16.gmra.mxu1 %v213_v32  ;;  %v172_v2 = vadd.f32 %v774_v19, %v171_v0 }
  0xaa   :  { %v149_v33 = vpop.f32.mrf.mxu0 }
  0xab   :  { %v150_v34 = vadd.f32 %v774_v19, %v149_v33  ;;  %v192_v5 = vmax.f32 %v172_v2, 0.0 }
  0xad   :  { %v183_v37 = vmax.f32 %v150_v34, 0.0  ;;  %v218_v6 = vpack.c.bf16 %v192_v5, %v191_v4 }
  0xb0   :  { %v174_v3 = vpop.f32.mrf.mxu3 }
  0xb1   :  { %v175_v8 = vadd.f32 %v774_v19, %v174_v3 }
  0xb2   :  { %v151_v35 = vpop.f32.mrf.mxu0 }
  0xb3   :  { %v152_v36 = vadd.f32 %v774_v19, %v151_v35  ;;  %v193_v10 = vmax.f32 %v175_v8, 0.0 }
  0xb5   :  { %v184_v38 = vmax.f32 %v152_v36, 0.0 }
  0xb7   :  { %v214_v39 = vpack.c.bf16 %v184_v38, %v183_v37 }
  0xb8   :  { %v176_v7 = vpop.f32.mrf.mxu3 }
  0xb9   :  { %287 = vmatmul.bf16.gmra.mxu1 %v214_v39  ;;  %v177_v9 = vadd.f32 %v774_v19, %v176_v7 }
  0xba   :  { %v154_v40 = vpop.f32.mrf.mxu0 }
  0xbb   :  { %v155_v41 = vadd.f32 %v774_v19, %v154_v40  ;;  %v194_v11 = vmax.f32 %v177_v9, 0.0 }
  0xbd   :  { %v185_v44 = vmax.f32 %v155_v41, 0.0  ;;  %v219_v12 = vpack.c.bf16 %v194_v11, %v193_v10 }
  0xc2   :  { %v156_v42 = vpop.f32.mrf.mxu0 }
  0xc3   :  { %v157_v43 = vadd.f32 %v774_v19, %v156_v42 }
  0xc5   :  { %v186_v45 = vmax.f32 %v157_v43, 0.0 }
  0xc7   :  { %v215_v46 = vpack.c.bf16 %v186_v45, %v185_v44 }
  0xc9   :  { %292 = vmatmul.bf16.gmra.mxu1 %v215_v46 }
  0xca   :  { %v159_v47 = vpop.f32.mrf.mxu0 }
  0xcb   :  { %v160_v49 = vadd.f32 %v774_v19, %v159_v47 }
  0xcd   :  { %v187_v53 = vmax.f32 %v160_v49, 0.0 }
  0xd2   :  { %v161_v50 = vpop.f32.mrf.mxu0 }
  0xd3   :  { %v162_v51 = vadd.f32 %v774_v19, %v161_v50 }
  0xd5   :  { %v188_v54 = vmax.f32 %v162_v51, 0.0 }
  0xd7   :  { %v216_v55 = vpack.c.bf16 %v188_v54, %v187_v53 }
  0xd9   :  { %297 = vmatmul.bf16.vlgmr.msra.gmra.mxu2 %v216_v55 }
  0xe9   :  { %302 = vmatmul.bf16.gmra.mxu2 %v217_v63 }
  0xf9   :  { %307 = vmatmul.bf16.gmra.mxu2 %v218_v6 }
 0x109   :  { %312 = vmatmul.bf16.gmra.mxu2 %v219_v12 }
 0x116   :  { %v278_v14 = vpop.f32.mrf.mxu1 }
 0x117   :  { %v279_v15 = vadd.f32 %v792_v13, %v278_v14 }
 0x119   :  { %v318_v17 = vmax.f32 %v279_v15, 0.0  ;;  %v388_v15 = vpop.permute.xlu1 %387 }
 0x11b   :  { %v336_v18 = vmul.f32 %v795_v16, %v318_v17 }
 0x11d   :  { %352 = vadd.xlane.f32.xlu0 %v336_v18 }
 0x11e   :  { %v280_v20 = vpop.f32.mrf.mxu1 }
 0x11f   :  { %v281_v21 = vadd.f32 %v792_v13, %v280_v20 }
 0x121   :  { %v319_v22 = vmax.f32 %v281_v21, 0.0  ;;  %v389_v21 = vperm.slane %v388_v15, 0 }
 0x123   :  { %v337_v19 = vmul.f32 %v795_v16, %v319_v22 }
 0x125   :  { %354 = vadd.xlane.f32.xlu0 %v337_v19 }
 0x126   :  { %v283_v23 = vpop.f32.mrf.mxu1 }
 0x127   :  { %v284_v24 = vadd.f32 %v792_v13, %v283_v23 }
 0x129   :  { %v320_v25 = vmax.f32 %v284_v24, 0.0 }
 0x12b   :  { %v338_v26 = vmul.f32 %v795_v16, %v320_v25 }
 0x12d   :  { %356 = vadd.xlane.f32.xlu1 %v338_v26 }
 0x12e   :  { %v285_v27 = vpop.f32.mrf.mxu1 }
 0x12f   :  { %v286_v28 = vadd.f32 %v792_v13, %v285_v27 }
 0x131   :  { %v321_v29 = vmax.f32 %v286_v28, 0.0 }
 0x133   :  { %v339_v30 = vmul.f32 %v795_v16, %v321_v29 }
 0x135   :  { %358 = vadd.xlane.f32.xlu1 %v339_v30 }
 0x136   :  { %v288_v31 = vpop.f32.mrf.mxu1 }
 0x137   :  { %v289_v32 = vadd.f32 %v792_v13, %v288_v31 }
 0x139   :  { %v322_v33 = vmax.f32 %v289_v32, 0.0 }
 0x13b   :  { %v340_v34 = vmul.f32 %v795_v16, %v322_v33 }
 0x13d   :  { %360 = vadd.xlane.f32.xlu2 %v340_v34 }
 0x13e   :  { %v290_v35 = vpop.f32.mrf.mxu1 }
 0x13f   :  { %v291_v36 = vadd.f32 %v792_v13, %v290_v35 }
 0x141   :  { %v323_v37 = vmax.f32 %v291_v36, 0.0 }
 0x143   :  { %v341_v38 = vmul.f32 %v795_v16, %v323_v37 }
 0x145   :  { %362 = vadd.xlane.f32.xlu2 %v341_v38 }
 0x146   :  { %v293_v39 = vpop.f32.mrf.mxu1 }
 0x147   :  { %v294_v40 = vadd.f32 %v792_v13, %v293_v39 }
 0x149   :  { %v324_v41 = vmax.f32 %v294_v40, 0.0 }
 0x14b   :  { %v342_v42 = vmul.f32 %v795_v16, %v324_v41 }
 0x14d   :  { %364 = vadd.xlane.f32.xlu0 %v342_v42 }
 0x14e   :  { %v295_v43 = vpop.f32.mrf.mxu1 }
 0x14f   :  { %v296_v44 = vadd.f32 %v792_v13, %v295_v43 }
 0x151   :  { %v325_v45 = vmax.f32 %v296_v44, 0.0 }
 0x153   :  { %v343_v46 = vmul.f32 %v795_v16, %v325_v45 }
 0x155   :  { %366 = vadd.xlane.f32.xlu1 %v343_v46 }
 0x15c   :  { %v298_v47 = vpop.f32.mrf.mxu2 }
 0x15d   :  { %v299_v48 = vadd.f32 %v792_v13, %v298_v47 }
 0x15f   :  { %v326_v49 = vmax.f32 %v299_v48, 0.0 }
 0x161   :  { %v344_v50 = vmul.f32 %v795_v16, %v326_v49 }
 0x163   :  { %368 = vadd.xlane.f32.xlu2 %v344_v50 }
 0x164   :  { %v300_v51 = vpop.f32.mrf.mxu2 }
 0x165   :  { %v301_v52 = vadd.f32 %v792_v13, %v300_v51 }
 0x167   :  { %v327_v53 = vmax.f32 %v301_v52, 0.0  ;;  %v471_v52 = vlaneseq }
 0x169   :  { %v345_v54 = vmul.f32 %v795_v16, %v327_v53 }
 0x16b   :  { %370 = vadd.xlane.f32.xlu0 %v345_v54  ;;  %v472_v54 = vand.u32 127, %v471_v52 }
 0x16c   :  { %v303_v55 = vpop.f32.mrf.mxu2 }
 0x16d   :  { %v304_v56 = vadd.f32 %v792_v13, %v303_v55  ;;  %v474_v55 = vadd.s32 4294967288, %v472_v54 }
 0x16f   :  { %v328_v57 = vmax.f32 %v304_v56, 0.0 }
 0x171   :  { %v346_v58 = vmul.f32 %v795_v16, %v328_v57 }
 0x173   :  { %372 = vadd.xlane.f32.xlu1 %v346_v58 }
 0x174   :  { %v305_v59 = vpop.f32.mrf.mxu2 }
 0x175   :  { %v306_v60 = vadd.f32 %v792_v13, %v305_v59  ;;  %v478_v59 = vadd.s32 4294967280, %v472_v54 }
 0x177   :  { %v329_v61 = vmax.f32 %v306_v60, 0.0 }
 0x179   :  { %v347_v62 = vmul.f32 %v795_v16, %v329_v61 }
 0x17b   :  { %374 = vadd.xlane.f32.xlu2 %v347_v62  ;;  %v482_v62 = vadd.s32 4294967272, %v472_v54 }
 0x17c   :  { %v308_v63 = vpop.f32.mrf.mxu2 }
 0x17d   :  { %v309_v0 = vadd.f32 %v792_v13, %v308_v63 }
 0x17f   :  { %v330_v1 = vmax.f32 %v309_v0, 0.0 }
 0x181   :  { %v348_v2 = vmul.f32 %v795_v16, %v330_v1 }
 0x183   :  { %376 = vadd.xlane.f32.xlu0 %v348_v2  ;;  %v490_v2 = vadd.s32 4294967256, %v472_v54 }
 0x184   :  { %v310_v3 = vpop.f32.mrf.mxu2 }
 0x185   :  { %v311_v4 = vadd.f32 %v792_v13, %v310_v3  ;;  %v486_v3 = vadd.s32 4294967264, %v472_v54 }
 0x187   :  { %v331_v5 = vmax.f32 %v311_v4, 0.0 }
 0x189   :  { %v349_v6 = vmul.f32 %v795_v16, %v331_v5 }
 0x18b   :  { %378 = vadd.xlane.f32.xlu1 %v349_v6 }
 0x18c   :  { %v313_v7 = vpop.f32.mrf.mxu2 }
 0x18d   :  { %v314_v8 = vadd.f32 %v792_v13, %v313_v7 }
 0x18f   :  { %v332_v9 = vmax.f32 %v314_v8, 0.0 }
 0x190   :  { %v353_v18 = vpop.xlane.xlu0 %352 }
 0x191   :  { %v350_v10 = vmul.f32 %v795_v16, %v332_v9  ;;  %v391_v19 = vadd.f32 %v389_v21, %v353_v18 }
 0x193   :  { %380 = vadd.xlane.f32.xlu2 %v350_v10  ;;  %v498_v10 = vadd.s32 4294967240, %v472_v54 }
 0x194   :  { %v315_v11 = vpop.f32.mrf.mxu2 }
 0x195   :  { %v316_v12 = vadd.f32 %v792_v13, %v315_v11 }
 0x197   :  { %v333_v14 = vmax.f32 %v316_v12, 0.0  ;;  %v494_v12 = vadd.s32 4294967248, %v472_v54 }
 0x198   :  { %v355_v24 = vpop.xlane.xlu0 %354 }
 0x199   :  { %v351_v17 = vmul.f32 %v795_v16, %v333_v14  ;;  %v392_v25 = vadd.f32 %v389_v21, %v355_v24  ;;  %v502_v14 = vadd.s32 4294967232, %v472_v54  ;;  %v514_v24 = vadd.s32 4294967208, %v472_v54 }
 0x19b   :  { %382 = vadd.xlane.f32.xlu0 %v351_v17 }
 0x1a0   :  { %v357_v20 = vpop.xlane.xlu1 %356 }
 0x1a1   :  { %v393_v27 = vadd.f32 %v389_v21, %v357_v20 }
 0x1a8   :  { %v359_v22 = vpop.xlane.xlu1 %358 }
 0x1a9   :  { %v394_v23 = vadd.f32 %v389_v21, %v359_v22 }
 0x1ab   :  { %433 = vperm.xlu1 %653, %v394_v23   ;;  %424 = vperm.xlu2 %654, %v391_v19   ;;  %v510_v19 = vadd.s32 4294967216, %v472_v54  ;;  %v506_v23 = vadd.s32 4294967224, %v472_v54 }
 0x1af   :  { %427 = vperm.xlu0 %655, %v392_v25  }
 0x1b0   :  { %v361_v26 = vpop.xlane.xlu2 %360 }
 0x1b1   :  { %v395_v28 = vadd.f32 %v389_v21, %v361_v26 }
 0x1b3   :  { %430 = vperm.xlu2 %654, %v393_v27  }
 0x1b8   :  { %v363_v13 = vpop.xlane.xlu2 %362 }
 0x1b9   :  { %v396_v29 = vadd.f32 %v389_v21, %v363_v13 }
 0x1bb   :  { %439 = vperm.xlu1 %653, %v396_v29   ;;  %436 = vperm.xlu2 %654, %v395_v28  }
 0x1c0   :  { %v365_v16 = vpop.xlane.xlu0 %364 }
 0x1c1   :  { %v397_v30 = vadd.f32 %v389_v21, %v365_v16 }
 0x1c3   :  { %442 = vperm.xlu2 %654, %v397_v30  }
 0x1c8   :  { %v367_v31 = vpop.xlane.xlu1 %366 }
 0x1c9   :  { %v398_v32 = vadd.f32 %v389_v21, %v367_v31  ;;  %v522_v31 = vadd.s32 4294967192, %v472_v54 }
 0x1cb   :  { %445 = vperm.xlu1 %653, %v398_v32   ;;  %v518_v32 = vadd.s32 4294967200, %v472_v54 }
 0x1d6   :  { %v369_v33 = vpop.xlane.xlu2 %368 }
 0x1d7   :  { %v399_v34 = vadd.f32 %v389_v21, %v369_v33 }
 0x1d9   :  { %448 = vperm.xlu0 %655, %v399_v34  }
 0x1de   :  { %v371_v35 = vpop.xlane.xlu0 %370 }
 0x1df   :  { %v400_v36 = vadd.f32 %v389_v21, %v371_v35 }
 0x1e1   :  { %451 = vperm.xlu2 %654, %v400_v36   ;;  %v526_v36 = vadd.s32 4294967184, %v472_v54 }
 0x1e6   :  { %v373_v37 = vpop.xlane.xlu1 %372 }
 0x1e7   :  { %v401_v38 = vadd.f32 %v389_v21, %v373_v37 }
 0x1e9   :  { %454 = vperm.xlu1 %653, %v401_v38   ;;  %v530_v38 = vadd.s32 4294967176, %v472_v54 }
 0x1ee   :  { %v375_v39 = vpop.xlane.xlu2 %374 }
 0x1ef   :  { %v402_v40 = vadd.f32 %v389_v21, %v375_v39 }
 0x1f1   :  { %457 = vperm.xlu0 %655, %v402_v40  }
 0x1f6   :  { %v377_v41 = vpop.xlane.xlu0 %376 }
 0x1f7   :  { %v403_v42 = vadd.f32 %v389_v21, %v377_v41 }
 0x1f9   :  { %460 = vperm.xlu2 %654, %v403_v42  }
 0x1fe   :  { %v379_v43 = vpop.xlane.xlu1 %378 }
 0x1ff   :  { %v404_v44 = vadd.f32 %v389_v21, %v379_v43 }
 0x201   :  { %463 = vperm.xlu1 %653, %v404_v44  }
 0x206   :  { %v381_v45 = vpop.xlane.xlu2 %380 }
 0x207   :  { %v405_v46 = vadd.f32 %v389_v21, %v381_v45 }
 0x209   :  { %466 = vperm.xlu0 %655, %v405_v46  }
 0x20e   :  { %v383_v47 = vpop.xlane.xlu0 %382  ;;  %v425_v49 = vpop.permute.xlu2 %424 }
 0x20f   :  { %v406_v48 = vadd.f32 %v389_v21, %v383_v47  ;;  %v473_v61 = vperm.slane %v425_v49, %v472_v54 }
 0x211   :  { %469 = vperm.xlu2 %654, %v406_v48  }
 0x216   :  { %v431_v50 = vpop.permute.xlu2 %430 }
 0x217   :  { %v479_v0 = vperm.slane %v431_v50, %v478_v59 }
 0x21d   :  { %v434_v51 = vpop.permute.xlu1 %433 }
 0x21e   :  { %v437_v53 = vpop.permute.xlu2 %436  ;;  %v483_v5 = vperm.slane %v434_v51, %v482_v62 }
 0x21f   :  { %v487_v11 = vperm.slane %v437_v53, %v486_v3 }
 0x221   :  { %v428_v56 = vpop.permute.xlu0 %427 }
 0x222   :  { %v475_v58 = vperm.slane %v428_v56, %v474_v55 }
 0x224   :  { %v477_v63 = vsel %vm476_vm1, %v475_v58, %v473_v61 }
 0x225   :  { %v481_v4 = vsel %vm480_vm2, %v479_v0, %v477_v63 }
 0x226   :  { %v443_v60 = vpop.permute.xlu2 %442  ;;  %v485_v8 = vsel %vm484_vm3, %v483_v5, %v481_v4 }
 0x227   :  { %v489_v15 = vsel %vm488_vm4, %v487_v11, %v485_v8  ;;  %v495_v21 = vperm.slane %v443_v60, %v494_v12 }
 0x22d   :  { %v440_v57 = vpop.permute.xlu1 %439 }
 0x22e   :  { %v491_v9 = vperm.slane %v440_v57, %v490_v2 }
 0x230   :  { %v493_v18 = vsel %vm492_vm5, %v491_v9, %v489_v15 }
 0x231   :  { %v497_v25 = vsel %vm496_vm6, %v495_v21, %v493_v18 }
 0x23b   :  { %v452_v6 = vpop.permute.xlu2 %451 }
 0x23c   :  { %v507_v16 = vperm.slane %v452_v6, %v506_v23 }
 0x23d   :  { %v446_v1 = vpop.permute.xlu1 %445 }
 0x23e   :  { %v499_v20 = vperm.slane %v446_v1, %v498_v10 }
 0x240   :  { %v501_v13 = vsel %vm500_vm7, %v499_v20, %v497_v25 }
 0x24b   :  { %v449_v7 = vpop.permute.xlu0 %448 }
 0x24c   :  { %v503_v22 = vperm.slane %v449_v7, %v502_v14 }
 0x24e   :  { %v505_v28 = vsel %vm504_vm8, %v503_v22, %v501_v13 }
 0x24f   :  { %v509_v34 = vsel %vm508_vm9, %v507_v16, %v505_v28 }
 0x253   :  { %v461_v26 = vpop.permute.xlu2 %460 }
 0x254   :  { %v519_v40 = vperm.slane %v461_v26, %v518_v32 }
 0x25b   :  { %v455_v17 = vpop.permute.xlu1 %454 }
 0x25c   :  { %v511_v29 = vperm.slane %v455_v17, %v510_v19 }
 0x25e   :  { %v513_v35 = vsel %vm512_vm10, %v511_v29, %v509_v34 }
 0x263   :  { %v458_v27 = vpop.permute.xlu0 %457 }
 0x264   :  { %v515_v30 = vperm.slane %v458_v27, %v514_v24 }
 0x266   :  { %v517_v37 = vsel %vm516_vm11, %v515_v30, %v513_v35 }
 0x267   :  { %v521_v43 = vsel %vm520_vm12, %v519_v40, %v517_v37 }
 0x26b   :  { %v470_v41 = vpop.permute.xlu2 %469 }
 0x26c   :  { %v531_v45 = vperm.slane %v470_v41, %v530_v38 }
 0x273   :  { %v464_v33 = vpop.permute.xlu1 %463 }
 0x274   :  { %v523_v39 = vperm.slane %v464_v33, %v522_v31 }
 0x276   :  { %v525_v46 = vsel %vm524_vm13, %v523_v39, %v521_v43 }
 0x27b   :  { %v467_v42 = vpop.permute.xlu0 %466 }
 0x27c   :  { %v527_v44 = vperm.slane %v467_v42, %v526_v36 }
 0x27e   :  { %v529_v47 = vsel %vm528_vm14, %v527_v44, %v525_v46 }
 0x27f   :  { %v533_v48 = vsel %vm532_vm15, %v531_v45, %v529_v47 }
 0x280   :  { %535 = vst [vmem:[%s834_s3] sm:$0x1] %v533_v48 }
 0x281   :  { %540 = vsyncpa [#allocation3], 1 }

</bundles_post_ra>
